<compile_context>
chip_gen: v5e
topology: v5e:2x2
jax: 0.10.0
libtpu: 0.0.40
codegen_flags: <defaults>
</compile_context>

<pallas_src>
import math

import jax
import jax.numpy as jnp
from jax import lax
from jax.experimental import pallas as pl
from jax.experimental.pallas import tpu as pltpu

_INV_SQRT2 = 0.7071067811865476  # 1/sqrt(2), constant multiply instead of divide


def _mlp_kernel(x_ref, w1_ref, b1_ref, w2_ref, b2_ref, o_ref, acc_ref):
    # x_ref  : (tm, D)  input token tile
    # w1_ref : (D, th)  c_fc weight column-tile
    # b1_ref : (1, th)  c_fc bias tile
    # w2_ref : (th, D)  c_proj weight row-tile
    # b2_ref : (1, D)   c_proj bias
    # o_ref  : (tm, D)  output tile (resident across the hidden axis)
    # acc_ref: (tm, D)  f32 accumulator scratch
    k = pl.program_id(1)

    @pl.when(k == 0)
    def _init():
        # Fold the c_proj bias into the accumulator init: removes one (tm, D)
        # f32 add from the finalize path that gates the output writeback DMA.
        acc_ref[...] = jnp.broadcast_to(
            b2_ref[...].astype(jnp.float32), acc_ref.shape)

    # c_fc partial: (tm, D) @ (D, th) on the MXU, f32 accumulation.
    h = jnp.dot(x_ref[...], w1_ref[...], preferred_element_type=jnp.float32)
    h = h + b1_ref[...].astype(jnp.float32)

    # Exact erf-based GELU (matches torch.nn.GELU default), kept in f32.
    h = 0.5 * h * (1.0 + lax.erf(h * _INV_SQRT2))

    # c_proj partial: (tm, th) @ (th, D), accumulated in the f32 scratch.
    # For bf16 operands, h is cast back to bf16 for a native bf16 MXU pass.
    acc_ref[...] += jnp.dot(h.astype(w2_ref.dtype), w2_ref[...],
                            preferred_element_type=jnp.float32)

    @pl.when(k == pl.num_programs(1) - 1)
    def _finalize():
        # dropout with p = 0.0 (eval) -> identity; bias already folded in.
        o_ref[...] = acc_ref[...].astype(o_ref.dtype)


def mlp_pallas(x, w_fc, b_fc, w_proj, b_proj, *, tm=None, th=None):
    """x: (M, D).  w_fc: (D, H), b_fc: (H,), w_proj: (H, D), b_proj: (D,)."""
    M, D = x.shape
    H = w_fc.shape[1]
    assert w_fc.shape == (D, H) and w_proj.shape == (H, D)
    isz = jnp.dtype(x.dtype).itemsize

    # ---- VMEM capacity: 128 MiB on v5e/v6e, 64 MiB on v7x. ----
    try:
        vmem_cap = int(pltpu.get_tpu_info().vmem_capacity_bytes)
    except Exception:
        vmem_cap = 64 << 20  # conservative fallback (v7x)
    budget = int(vmem_cap * 0.80)  # headroom for compiler scratch / semaphores

    def tile_bytes(tm_, th_):
        return (2 * tm_ * D * isz        # x tile (double buffered)
                + 2 * tm_ * D * isz      # output tile
                + 2 * D * th_ * isz      # W_fc tile
                + 2 * th_ * isz          # b_fc tile
                + 2 * th_ * D * isz      # W_proj tile
                + 2 * D * isz            # b_proj
                + tm_ * D * 4            # f32 accumulator scratch
                + tm_ * th_ * 4          # f32 GELU intermediate h
                + tm_ * th_ * isz)       # cast of h fed to the c_proj matmul

    # ---- Row tile: big (default 512) so weight re-streaming is amortized. ----
    def pick_row_tile(desired):
        desired = max(1, min(int(desired), M))
        for t in range(desired, 0, -1):
            if M % t == 0 and (t % 8 == 0 or t == M):
                return t
        return M

    tm_sel = pick_row_tile(512 if tm is None else tm)

    # ---- Hidden tile: prefer full residency (th = H -> weights DMA'd once),
    #      else the largest 128-aligned tile that fits the VMEM budget. ----
    def pick_hidden_tile(tm_):
        if th is not None:
            t = min(int(th), H)
            assert H % t == 0 and (t % 128 == 0 or t == H), \
                "hidden tile must divide H and be 128-aligned (or equal H)"
            return t
        cands = [H] + [c for c in (4096, 2048, 1024, 512, 256, 128)
                       if c < H and H % c == 0]
        for c in cands:
            if tile_bytes(tm_, c) <= budget:
                return c
        return cands[-1]

    th_sel = pick_hidden_tile(tm_sel)
    # If the configuration still doesn't fit (tiny-VMEM chip), shrink tm.
    while tile_bytes(tm_sel, th_sel) > budget and tm_sel > 8:
        tm_sel = pick_row_tile(tm_sel // 2)
        th_sel = pick_hidden_tile(tm_sel)

    tm_, th_ = tm_sel, th_sel
    assert M % tm_ == 0 and (tm_ % 8 == 0 or tm_ == M)
    assert H % th_ == 0 and (th_ % 128 == 0 or th_ == H)

    grid = (M // tm_, H // th_)
    streamed = th_ < H
    weight_passes = (M // tm_) if streamed else 1

    b_fc2 = b_fc.reshape(1, H)
    b_proj2 = b_proj.reshape(1, D)

    tb = tile_bytes(tm_, th_)
    # Triple-buffer the streamed weight tiles when there is headroom (hides
    # HBM latency jitter on v5e/v6e; skipped when VMEM is tight, e.g. v7x).
    extra_buf = (D * th_ + th_ * D) * isz
    multibuffer = streamed and (tb + extra_buf) <= budget

    vmem_bytes = int(1.25 * (tb + (extra_buf if multibuffer else 0))) + (8 << 20)
    vmem_bytes = max(vmem_bytes, 32 << 20)
    vmem_bytes = min(vmem_bytes, budget)   # never exceed physical VMEM (v7x!)

    def weight_spec(shape, index_map):
        if multibuffer:
            try:
                return pl.BlockSpec(shape, index_map,
                                    pipeline_mode=pl.Buffered(3))
            except Exception:
                pass
        return pl.BlockSpec(shape, index_map)

    cost = pl.CostEstimate(
        flops=4 * M * D * H,                 # two matmuls, 2*M*D*H each
        transcendentals=M * H,               # erf per hidden activation
        bytes_accessed=int(
            (x.size + M * D) * isz                                  # x + out
            + weight_passes * (w_fc.size + w_proj.size) * isz       # weights
            + (b_fc.size + b_proj.size) * isz),
    )

    return pl.pallas_call(
        _mlp_kernel,
        out_shape=jax.ShapeDtypeStruct((M, D), x.dtype),
        grid_spec=pltpu.PrefetchScalarGridSpec(
            num_scalar_prefetch=0,
            grid=grid,
            in_specs=[
                pl.BlockSpec((tm_, D), lambda i, k: (i, 0)),   # x row tile
                weight_spec((D, th_), lambda i, k: (0, k)),    # W_fc col tile
                pl.BlockSpec((1, th_), lambda i, k: (0, k)),   # b_fc tile
                weight_spec((th_, D), lambda i, k: (k, 0)),    # W_proj row tile
                pl.BlockSpec((1, D), lambda i, k: (0, 0)),     # b_proj
            ],
            out_specs=pl.BlockSpec((tm_, D), lambda i, k: (i, 0)),
            scratch_shapes=[pltpu.VMEM((tm_, D), jnp.float32)],
        ),
        compiler_params=pltpu.CompilerParams(
            dimension_semantics=("parallel", "arbitrary"),
            vmem_limit_bytes=int(vmem_bytes)),
        cost_estimate=cost,
    )(x, w_fc, b_fc2, w_proj, b_proj2)


def mlp_reference(x, w_fc, b_fc, w_proj, b_proj):
    h = x.astype(jnp.float32) @ w_fc.astype(jnp.float32) + b_fc.astype(jnp.float32)
    h = 0.5 * h * (1.0 + lax.erf(h / math.sqrt(2.0)))
    return h @ w_proj.astype(jnp.float32) + b_proj.astype(jnp.float32)


if __name__ == "__main__":
    # Small, lane-aligned GPT-2-like config: batch=2, seq=8, n_embd=128, hidden=512.
    batch, seq, n_embd = 2, 8, 128
    hidden = 4 * n_embd

    key = jax.random.PRNGKey(0)
    k_x, k_w1, k_b1, k_w2, k_b2 = jax.random.split(key, 5)

    x = jax.random.normal(k_x, (batch, seq, n_embd), dtype=jnp.float32)
    # deterministic parameter init (scaled normal, akin to GPT-2 init)
    w_fc = jax.random.normal(k_w1, (n_embd, hidden), dtype=jnp.float32) * 0.02
    b_fc = jax.random.normal(k_b1, (hidden,), dtype=jnp.float32) * 0.02
    w_proj = jax.random.normal(k_w2, (hidden, n_embd), dtype=jnp.float32) * 0.02
    b_proj = jax.random.normal(k_b2, (n_embd,), dtype=jnp.float32) * 0.02

    x2d = x.reshape(batch * seq, n_embd)  # (tokens, features) = (16, 128)
    ref = mlp_reference(x2d, w_fc, b_fc, w_proj, b_proj)

    # 1) Auto-tiled path: weights fit VMEM -> th = H residency, single k step.
    out_auto = mlp_pallas(x2d, w_fc, b_fc, w_proj, b_proj)
    jax.block_until_ready(out_auto)
    assert jnp.allclose(out_auto, ref.astype(out_auto.dtype),
                        atol=1e-4, rtol=1e-4), "auto-tiled mismatch vs reference"

    # 2) Explicit small tiles: exercises the multi-row-tile streamed-weight
    #    path (grid (2, 4): pl.when init/finalize + accumulator across k,
    #    triple-buffered weight stream).
    out_tiled = mlp_pallas(x2d, w_fc, b_fc, w_proj, b_proj, tm=8, th=128)
    jax.block_until_ready(out_tiled)
    assert jnp.allclose(out_tiled, ref.astype(out_tiled.dtype),
                        atol=1e-4, rtol=1e-4), "tiled mismatch vs reference"

    # 3) bf16 operand path (f32 accumulation inside the kernel; biases f32).
    out_bf16 = mlp_pallas(x2d.astype(jnp.bfloat16), w_fc.astype(jnp.bfloat16),
                          b_fc, w_proj.astype(jnp.bfloat16), b_proj,
                          tm=8, th=128)
    jax.block_until_ready(out_bf16)
    assert jnp.allclose(out_bf16.astype(jnp.float32), ref,
                        atol=3e-2, rtol=3e-2), "bf16 mismatch vs reference"

    print("KERNEL_OK")
</pallas_src>

<mosaic_0001>
module attributes {stable_mosaic.version = 11 : i64} {
  func.func @_mlp_kernel(%arg0: i32, %arg1: i32, %arg2: memref<16x128xf32, #tpu.memory_space<vmem>>, %arg3: memref<128x512xf32, #tpu.memory_space<vmem>>, %arg4: memref<1x512xf32, #tpu.memory_space<vmem>>, %arg5: memref<512x128xf32, #tpu.memory_space<vmem>>, %arg6: memref<1x128xf32, #tpu.memory_space<vmem>>, %arg7: memref<16x128xf32, #tpu.memory_space<vmem>>, %arg8: memref<16x128xf32, #tpu.memory_space<vmem>>) attributes {dimension_semantics = [#tpu.dimension_semantics<parallel>, #tpu.dimension_semantics<arbitrary>], iteration_bounds = array<i64: 1, 1>, scalar_prefetch = 0 : i64, scratch_operands = 1 : i64, tpu.core_type = #tpu.core_type<tc>, window_params = [{transform_indices = @transform_0, window_bounds = array<i64: 16, 128>}, {transform_indices = @transform_1, window_bounds = array<i64: 128, 512>}, {transform_indices = @transform_2, window_bounds = array<i64: 1, 512>}, {transform_indices = @transform_3, window_bounds = array<i64: 512, 128>}, {pipeline_mode = #tpu.pipeline_mode<synchronous>, transform_indices = @transform_4, window_bounds = array<i64: 1, 128>}, {transform_indices = @transform_5, window_bounds = array<i64: 16, 128>}]} {
    %c0_i32 = arith.constant 0 : i32
    %0 = arith.cmpi eq, %arg1, %c0_i32 : i32
    %1 = arith.extui %0 : i1 to i32
    %c0_i32_0 = arith.constant 0 : i32
    %2 = arith.cmpi ne, %1, %c0_i32_0 : i32
    scf.if %2 {
      %c0_18 = arith.constant 0 : index
      %c0_19 = arith.constant 0 : index
      %25 = vector.load %arg6[%c0_18, %c0_19] : memref<1x128xf32, #tpu.memory_space<vmem>>, vector<1x128xf32>
      %26 = vector.shape_cast %25 : vector<1x128xf32> to vector<1x128xf32>
      %27 = vector.broadcast %26 : vector<1x128xf32> to vector<16x128xf32>
      %c0_20 = arith.constant 0 : index
      %c0_21 = arith.constant 0 : index
      %28 = vector.load %arg8[%c0_20, %c0_21] : memref<16x128xf32, #tpu.memory_space<vmem>>, vector<16x128xf32>
      tpu.vector_store %arg8[%c0_20, %c0_21], %27 {strides = array<i32>} : memref<16x128xf32, #tpu.memory_space<vmem>>, vector<16x128xf32>,
    } else {
    }
    %c0 = arith.constant 0 : index
    %c0_1 = arith.constant 0 : index
    %3 = vector.load %arg2[%c0, %c0_1] : memref<16x128xf32, #tpu.memory_space<vmem>>, vector<16x128xf32>
    %c0_2 = arith.constant 0 : index
    %c0_3 = arith.constant 0 : index
    %4 = vector.load %arg3[%c0_2, %c0_3] : memref<128x512xf32, #tpu.memory_space<vmem>>, vector<128x512xf32>
    %cst = arith.constant dense<0.000000e+00> : vector<16x512xf32>
    %5 = tpu.matmul %3, %4, %cst {dimension_numbers = #tpu.dot_dimension_numbers<[1], [0], [0], [1], [0, 0, 1, 1], [], []>} : vector<16x128xf32>, vector<128x512xf32>, vector<16x512xf32> -> vector<16x512xf32>
    %c0_4 = arith.constant 0 : index
    %c0_5 = arith.constant 0 : index
    %6 = vector.load %arg4[%c0_4, %c0_5] : memref<1x512xf32, #tpu.memory_space<vmem>>, vector<1x512xf32>
    %7 = vector.broadcast %6 : vector<1x512xf32> to vector<16x512xf32>
    %8 = arith.addf %5, %7 : vector<16x512xf32>
    %cst_6 = arith.constant 5.000000e-01 : f32
    %9 = vector.broadcast %cst_6 : f32 to vector<16x512xf32>
    %10 = arith.mulf %9, %8 : vector<16x512xf32>
    %cst_7 = arith.constant 0.707106769 : f32
    %11 = vector.broadcast %cst_7 : f32 to vector<16x512xf32>
    %12 = arith.mulf %8, %11 : vector<16x512xf32>
    %13 = math.erf %12 : vector<16x512xf32>
    %cst_8 = arith.constant 1.000000e+00 : f32
    %14 = vector.broadcast %cst_8 : f32 to vector<16x512xf32>
    %15 = arith.addf %14, %13 : vector<16x512xf32>
    %16 = arith.mulf %10, %15 : vector<16x512xf32>
    %c0_9 = arith.constant 0 : index
    %c0_10 = arith.constant 0 : index
    %17 = vector.load %arg8[%c0_9, %c0_10] : memref<16x128xf32, #tpu.memory_space<vmem>>, vector<16x128xf32>
    %c0_11 = arith.constant 0 : index
    %c0_12 = arith.constant 0 : index
    %18 = vector.load %arg5[%c0_11, %c0_12] : memref<512x128xf32, #tpu.memory_space<vmem>>, vector<512x128xf32>
    %cst_13 = arith.constant dense<0.000000e+00> : vector<16x128xf32>
    %19 = tpu.matmul %16, %18, %cst_13 {dimension_numbers = #tpu.dot_dimension_numbers<[1], [0], [0], [1], [0, 0, 1, 1], [], []>} : vector<16x512xf32>, vector<512x128xf32>, vector<16x128xf32> -> vector<16x128xf32>
    %20 = arith.addf %17, %19 : vector<16x128xf32>
    %c0_14 = arith.constant 0 : index
    %c0_15 = arith.constant 0 : index
    %21 = vector.load %arg8[%c0_14, %c0_15] : memref<16x128xf32, #tpu.memory_space<vmem>>, vector<16x128xf32>
    tpu.vector_store %arg8[%c0_14, %c0_15], %20 {strides = array<i32>} : memref<16x128xf32, #tpu.memory_space<vmem>>, vector<16x128xf32>,
    %c0_i32_16 = arith.constant 0 : i32
    %22 = arith.cmpi eq, %arg1, %c0_i32_16 : i32
    %23 = arith.extui %22 : i1 to i32
    %c0_i32_17 = arith.constant 0 : i32
    %24 = arith.cmpi ne, %23, %c0_i32_17 : i32
    scf.if %24 {
      %c0_18 = arith.constant 0 : index
      %c0_19 = arith.constant 0 : index
      %25 = vector.load %arg8[%c0_18, %c0_19] : memref<16x128xf32, #tpu.memory_space<vmem>>, vector<16x128xf32>
      %c0_20 = arith.constant 0 : index
      %c0_21 = arith.constant 0 : index
      %26 = vector.load %arg7[%c0_20, %c0_21] : memref<16x128xf32, #tpu.memory_space<vmem>>, vector<16x128xf32>
      tpu.vector_store %arg7[%c0_20, %c0_21], %25 {strides = array<i32>} : memref<16x128xf32, #tpu.memory_space<vmem>>, vector<16x128xf32>,
    } else {
    }
    return
  }
  func.func @transform_0(%arg0: i32, %arg1: i32) -> (i32, i32) {
    %c0_i32 = arith.constant 0 : i32
    %c0_i32_0 = arith.constant 0 : i32
    return %arg0, %c0_i32 : i32, i32
  }
  func.func @transform_1(%arg0: i32, %arg1: i32) -> (i32, i32) {
    %c0_i32 = arith.constant 0 : i32
    %c0_i32_0 = arith.constant 0 : i32
    return %c0_i32, %arg1 : i32, i32
  }
  func.func @transform_2(%arg0: i32, %arg1: i32) -> (i32, i32) {
    %c0_i32 = arith.constant 0 : i32
    %c0_i32_0 = arith.constant 0 : i32
    return %c0_i32, %arg1 : i32, i32
  }
  func.func @transform_3(%arg0: i32, %arg1: i32) -> (i32, i32) {
    %c0_i32 = arith.constant 0 : i32
    %c0_i32_0 = arith.constant 0 : i32
    return %arg1, %c0_i32 : i32, i32
  }
  func.func @transform_4(%arg0: i32, %arg1: i32) -> (i32, i32) {
    %c0_i32 = arith.constant 0 : i32
    %c0_i32_0 = arith.constant 0 : i32
    %c0_i32_1 = arith.constant 0 : i32
    return %c0_i32, %c0_i32_0 : i32, i32
  }
  func.func @transform_5(%arg0: i32, %arg1: i32) -> (i32, i32) {
    %c0_i32 = arith.constant 0 : i32
    %c0_i32_0 = arith.constant 0 : i32
    return %arg0, %c0_i32 : i32, i32
  }
}

</mosaic_0001>

<bundles_post_ra>
// kernel: tpu_custom_call.1
= control target key start
LH: loop header
LB: loop body
LE: loop exit
PB: predicated region body
PF: predicated region fallthrough
CT: control target
= control target key end

     0   :  { %10 = vsyncpa [#allocation4], 0  ;;  %s1344_s0 = inlined_call_operand.hbm [shape: f32[16,128], index: 0, kind: input, shape index: {}]   ;;  %s1345_s1 = inlined_call_operand.hbm [shape: f32[128,512], index: 1, kind: input, shape index: {}]   ;;  %s1346_s2 = inlined_call_operand.hbm [shape: f32[1,512], index: 2, kind: input, shape index: {}]   ;;  %s1347_s3 = inlined_call_operand.hbm [shape: f32[512,128], index: 3, kind: input, shape index: {}]   ;;  %s1348_s4 = inlined_call_operand.vmem [shape: f32[1,128], index: 4, kind: input, shape index: {}]   ;;  %s1349_s5 = inlined_call_operand.hbm [shape: f32[16,128], index: 5, kind: output, shape index: {}]  }
   0x1   :  { %11 = vsyncpa [#allocation7], 0 }
   0x2   :  { %12 = vsyncpa [#allocation10], 0  ;;  %s31_s20 = sshll.u32 %s1345_s1, 4  ;;  %s32_s20 = int_to_ptr.hbm [resolvable:$true] %s31_s20 }
   0x3   :  { %13 = vsyncpa [#allocation5], 0  ;;  %s964_s21 = smov [#allocation6]   ;;  %s18_s25 = sshll.u32 %s1344_s0, 4  ;;  %s19_s25 = int_to_ptr.hbm [resolvable:$true] %s18_s25 }
   0x4   :  { %s33_s22 = sshll.u32 %s964_s21, 4  ;;  %s965_s26 = smov 512   ;;  %s34_s22 = int_to_ptr.vmem [resolvable:$true] %s33_s22 }
   0x5   :  { %s966_s27 = smov 32   ;;  %s967_s28 = smov [#allocation3]  }
   0x6   :  { %39 = dma.hbm_to_vmem [thread:$0]  %s32_s20, 8192, %s34_s22, [#allocation7], %s965_s26, %s965_s26, %s966_s27  }
   0x7   :  { %s20_s29 = sshll.u32 %s967_s28, 4  ;;  %s968_s30 = smov 128   ;;  %s21_s29 = int_to_ptr.vmem [resolvable:$true] %s20_s29 }
   0x8   :  { %s969_s6 = smov 8   ;;  %s45_s8 = sshll.u32 %s1346_s2, 4  ;;  %s46_s8 = int_to_ptr.hbm [resolvable:$true] %s45_s8 }
   0x9   :  { %26 = dma.hbm_to_vmem [thread:$0]  %s19_s25, 256, %s21_s29, [#allocation4], %s968_s30, %s968_s30, %s969_s6  }
   0xa   :  { %s970_s9 = smov [#allocation8]   ;;  %s55_s12 = sshll.u32 %s1347_s3, 4  ;;  %s56_s12 = int_to_ptr.hbm [resolvable:$true] %s55_s12 }
   0xb   :  { %s47_s0 = sshll.u32 %s970_s9, 4  ;;  %s971_s13 = smov [#allocation9]   ;;  %s48_s0 = int_to_ptr.vmem [resolvable:$true] %s47_s0 }
   0xc   :  { %50 = dma.hbm_to_vmem [thread:$0]  %s46_s8, 64, %s48_s0, [#allocation7]  }
   0xd   :  { %s57_s14 = sshll.u32 %s971_s13, 4  ;;  %s58_s14 = int_to_ptr.vmem [resolvable:$true] %s57_s14 }
   0xe   :  { %63 = dma.hbm_to_vmem [thread:$0]  %s56_s12, 8192, %s58_s14, [#allocation10], %s968_s30, %s968_s30, %s969_s6  }
   0xf   :  { %956 = dma.done.wait [#allocation4], 256  }
  0x10   :  { %957 = vsyncadd [#allocation4], 4294967040 }
  0x11   :  { %958 = dma.done.wait [#allocation7], 8256  }
  0x12   :  { %959 = vsyncadd [#allocation7], 4294959040 }
  0x13   :  { %960 = dma.done.wait [#allocation10], 8192  }
  0x14   :  { %961 = vsyncadd [#allocation10], 4294959104  ;;  %v154_v0 = vld [vmem:[#allocation6 + $0x1e0] sm:$0xff]  ;;  %v155_v1 = vld [vmem:[#allocation6 + $0x1e8] sm:$0xff]  ;;  %s972_s15 = smov [#allocation11]   ;;  %s787_s19 = sshll.u32 %s1349_s5, 4  ;;  %s788_s19 = int_to_ptr.hbm [resolvable:$true] %s787_s19 }
  0x15   :  { %v156_v2 = vld [vmem:[#allocation6 + $0x1f0] sm:$0xff]  ;;  %168 = vmatpush.msra.mxu0 %v154_v0  ;;  %191 = vmatpush.msra.mxu1 %v155_v1  ;;  %v157_v3 = vld [vmem:[#allocation6 + $0x1f8] sm:$0xff]  ;;  %v150_v4 = vld [vmem:[#allocation6 + $0x1c0] sm:$0xff]  ;;  %s785_s16 = sshll.u32 %s972_s15, 4  ;;  %s786_s16 = int_to_ptr.vmem [resolvable:$true] %s785_s16 }
  0x16   :  { %v151_v5 = vld [vmem:[#allocation6 + $0x1c8] sm:$0xff]  ;;  %214 = vmatpush.msra.mxu2 %v156_v2  ;;  %237 = vmatpush.msra.mxu3 %v157_v3  ;;  %v152_v6 = vld [vmem:[#allocation6 + $0x1d0] sm:$0xff]  ;;  %v153_v7 = vld [vmem:[#allocation6 + $0x1d8] sm:$0xff] }
  0x17   :  { %v146_v8 = vld [vmem:[#allocation6 + $0x1a0] sm:$0xff]  ;;  %169 = vmatpush.msra.mxu0 %v150_v4  ;;  %192 = vmatpush.msra.mxu1 %v151_v5  ;;  %v147_v9 = vld [vmem:[#allocation6 + $0x1a8] sm:$0xff]  ;;  %v148_v10 = vld [vmem:[#allocation6 + $0x1b0] sm:$0xff] }
  0x18   :  { %v149_v11 = vld [vmem:[#allocation6 + $0x1b8] sm:$0xff]  ;;  %215 = vmatpush.msra.mxu2 %v152_v6  ;;  %238 = vmatpush.msra.mxu3 %v153_v7  ;;  %v142_v12 = vld [vmem:[#allocation6 + $0x180] sm:$0xff]  ;;  %v143_v13 = vld [vmem:[#allocation6 + $0x188] sm:$0xff] }
  0x19   :  { %170 = vmatpush.msra.mxu0 %v146_v8  ;;  %193 = vmatpush.msra.mxu1 %v147_v9  ;;  %v144_v14 = vld [vmem:[#allocation6 + $0x190] sm:$0xff]  ;;  %v145_v15 = vld [vmem:[#allocation6 + $0x198] sm:$0xff]  ;;  %v138_v16 = vld [vmem:[#allocation6 + $0x160] sm:$0xff] }
  0x1a   :  { %216 = vmatpush.msra.mxu2 %v148_v10  ;;  %239 = vmatpush.msra.mxu3 %v149_v11  ;;  %v139_v17 = vld [vmem:[#allocation6 + $0x168] sm:$0xff]  ;;  %v140_v18 = vld [vmem:[#allocation6 + $0x170] sm:$0xff]  ;;  %v141_v19 = vld [vmem:[#allocation6 + $0x178] sm:$0xff] }
  0x1b   :  { %171 = vmatpush.msra.mxu0 %v142_v12  ;;  %194 = vmatpush.msra.mxu1 %v143_v13  ;;  %v134_v20 = vld [vmem:[#allocation6 + $0x140] sm:$0xff]  ;;  %v135_v21 = vld [vmem:[#allocation6 + $0x148] sm:$0xff]  ;;  %v136_v22 = vld [vmem:[#allocation6 + $0x150] sm:$0xff] }
  0x1c   :  { %217 = vmatpush.msra.mxu2 %v144_v14  ;;  %240 = vmatpush.msra.mxu3 %v145_v15  ;;  %v137_v23 = vld [vmem:[#allocation6 + $0x158] sm:$0xff]  ;;  %v130_v24 = vld [vmem:[#allocation6 + $0x120] sm:$0xff]  ;;  %v131_v25 = vld [vmem:[#allocation6 + $0x128] sm:$0xff] }
  0x1d   :  { %172 = vmatpush.msra.mxu0 %v138_v16  ;;  %195 = vmatpush.msra.mxu1 %v139_v17  ;;  %v132_v26 = vld [vmem:[#allocation6 + $0x130] sm:$0xff]  ;;  %v133_v27 = vld [vmem:[#allocation6 + $0x138] sm:$0xff]  ;;  %v126_v28 = vld [vmem:[#allocation6 + $0x100] sm:$0xff] }
  0x1e   :  { %218 = vmatpush.msra.mxu2 %v140_v18  ;;  %241 = vmatpush.msra.mxu3 %v141_v19  ;;  %v127_v29 = vld [vmem:[#allocation6 + $0x108] sm:$0xff]  ;;  %v128_v30 = vld [vmem:[#allocation6 + $0x110] sm:$0xff]  ;;  %v129_v31 = vld [vmem:[#allocation6 + $0x118] sm:$0xff] }
  0x1f   :  { %173 = vmatpush.msra.mxu0 %v134_v20  ;;  %196 = vmatpush.msra.mxu1 %v135_v21  ;;  %v122_v32 = vld [vmem:[#allocation6 + $0xe0] sm:$0xff]  ;;  %v123_v33 = vld [vmem:[#allocation6 + $0xe8] sm:$0xff]  ;;  %v124_v34 = vld [vmem:[#allocation6 + $0xf0] sm:$0xff] }
  0x20   :  { %219 = vmatpush.msra.mxu2 %v136_v22  ;;  %242 = vmatpush.msra.mxu3 %v137_v23  ;;  %v125_v35 = vld [vmem:[#allocation6 + $0xf8] sm:$0xff]  ;;  %v118_v36 = vld [vmem:[#allocation6 + $0xc0] sm:$0xff]  ;;  %v119_v37 = vld [vmem:[#allocation6 + $0xc8] sm:$0xff] }
  0x21   :  { %174 = vmatpush.msra.mxu0 %v130_v24  ;;  %197 = vmatpush.msra.mxu1 %v131_v25  ;;  %v120_v38 = vld [vmem:[#allocation6 + $0xd0] sm:$0xff]  ;;  %v121_v39 = vld [vmem:[#allocation6 + $0xd8] sm:$0xff]  ;;  %v114_v40 = vld [vmem:[#allocation6 + $0xa0] sm:$0xff] }
  0x22   :  { %220 = vmatpush.msra.mxu2 %v132_v26  ;;  %243 = vmatpush.msra.mxu3 %v133_v27  ;;  %v115_v41 = vld [vmem:[#allocation6 + $0xa8] sm:$0xff]  ;;  %v116_v42 = vld [vmem:[#allocation6 + $0xb0] sm:$0xff]  ;;  %v117_v43 = vld [vmem:[#allocation6 + $0xb8] sm:$0xff] }
  0x23   :  { %175 = vmatpush.msra.mxu0 %v126_v28  ;;  %198 = vmatpush.msra.mxu1 %v127_v29  ;;  %v110_v44 = vld [vmem:[#allocation6 + $0x80] sm:$0xff]  ;;  %v111_v45 = vld [vmem:[#allocation6 + $0x88] sm:$0xff]  ;;  %v112_v46 = vld [vmem:[#allocation6 + $0x90] sm:$0xff] }
  0x24   :  { %221 = vmatpush.msra.mxu2 %v128_v30  ;;  %244 = vmatpush.msra.mxu3 %v129_v31  ;;  %v113_v47 = vld [vmem:[#allocation6 + $0x98] sm:$0xff]  ;;  %v106_v48 = vld [vmem:[#allocation6 + $0x60] sm:$0xff]  ;;  %v107_v49 = vld [vmem:[#allocation6 + $0x68] sm:$0xff] }
  0x25   :  { %176 = vmatpush.msra.mxu0 %v122_v32  ;;  %199 = vmatpush.msra.mxu1 %v123_v33  ;;  %v108_v50 = vld [vmem:[#allocation6 + $0x70] sm:$0xff]  ;;  %v109_v51 = vld [vmem:[#allocation6 + $0x78] sm:$0xff]  ;;  %v102_v52 = vld [vmem:[#allocation6 + $0x40] sm:$0xff] }
  0x26   :  { %222 = vmatpush.msra.mxu2 %v124_v34  ;;  %245 = vmatpush.msra.mxu3 %v125_v35  ;;  %v103_v53 = vld [vmem:[#allocation6 + $0x48] sm:$0xff]  ;;  %v104_v54 = vld [vmem:[#allocation6 + $0x50] sm:$0xff]  ;;  %v105_v55 = vld [vmem:[#allocation6 + $0x58] sm:$0xff] }
  0x27   :  { %177 = vmatpush.msra.mxu0 %v118_v36  ;;  %200 = vmatpush.msra.mxu1 %v119_v37  ;;  %v98_v56 = vld [vmem:[#allocation6 + $0x20] sm:$0xff]  ;;  %v99_v57 = vld [vmem:[#allocation6 + $0x28] sm:$0xff]  ;;  %v100_v58 = vld [vmem:[#allocation6 + $0x30] sm:$0xff] }
  0x28   :  { %223 = vmatpush.msra.mxu2 %v120_v38  ;;  %246 = vmatpush.msra.mxu3 %v121_v39  ;;  %v101_v59 = vld [vmem:[#allocation6 + $0x38] sm:$0xff]  ;;  %v94_v60 = vld [vmem:[#allocation6] sm:$0xff]  ;;  %v95_v61 = vld [vmem:[#allocation6 + $0x8] sm:$0xff] }
  0x29   :  { %178 = vmatpush.msra.mxu0 %v114_v40  ;;  %201 = vmatpush.msra.mxu1 %v115_v41  ;;  %v96_v62 = vld [vmem:[#allocation6 + $0x10] sm:$0xff]  ;;  %v97_v63 = vld [vmem:[#allocation6 + $0x18] sm:$0xff]  ;;  %v1021_v2 = vld [vmem:[#allocation8] sm:$0xf] }
  0x2a   :  { %224 = vmatpush.msra.mxu2 %v116_v42  ;;  %247 = vmatpush.msra.mxu3 %v117_v43  ;;  %v92_v0 = vld [vmem:[#allocation3] sm:$0xff]  ;;  %v93_v1 = vld [vmem:[#allocation3 + $0x8] sm:$0xff]  ;;  %v160_v3 = vperm.slane %v1021_v2, 0  ;;  %v161_v4 = vperm.slane %v1021_v2, 1  ;;  %v162_v11 = vperm.slane %v1021_v2, 2  ;;  %v163_v12 = vperm.slane %v1021_v2, 3 }
  0x2b   :  { %179 = vmatpush.msra.mxu0 %v110_v44  ;;  %202 = vmatpush.msra.mxu1 %v111_v45 }
  0x2c   :  { %225 = vmatpush.msra.mxu2 %v112_v46  ;;  %248 = vmatpush.msra.mxu3 %v113_v47 }
  0x2d   :  { %180 = vmatpush.msra.mxu0 %v106_v48  ;;  %203 = vmatpush.msra.mxu1 %v107_v49 }
  0x2e   :  { %226 = vmatpush.msra.mxu2 %v108_v50  ;;  %249 = vmatpush.msra.mxu3 %v109_v51 }
  0x2f   :  { %181 = vmatpush.msra.mxu0 %v102_v52  ;;  %204 = vmatpush.msra.mxu1 %v103_v53 }
  0x30   :  { %227 = vmatpush.msra.mxu2 %v104_v54  ;;  %250 = vmatpush.msra.mxu3 %v105_v55 }
  0x31   :  { %182 = vmatpush.msra.mxu0 %v98_v56  ;;  %205 = vmatpush.msra.mxu1 %v99_v57 }
  0x32   :  { %228 = vmatpush.msra.mxu2 %v100_v58  ;;  %251 = vmatpush.msra.mxu3 %v101_v59 }
  0x33   :  { %183 = vmatpush.msra.mxu0 %v94_v60  ;;  %206 = vmatpush.msra.mxu1 %v95_v61 }
  0x34   :  { %229 = vmatpush.msra.mxu2 %v96_v62  ;;  %252 = vmatpush.msra.mxu3 %v97_v63 }
  0x35   :  { %184 = vmatmul.f32.vlgmr.msra.gmra.mxu0 %v92_v0  ;;  %207 = vmatmul.f32.vlgmr.msra.gmra.mxu1 %v92_v0 }
  0x36   :  { %230 = vmatmul.f32.vlgmr.msra.gmra.mxu2 %v92_v0  ;;  %253 = vmatmul.f32.vlgmr.msra.gmra.mxu3 %v92_v0  ;;  %v629_v0 = vld [vmem:[#allocation9 + $0x78] sm:$0xff] }
  0x37   :  { %678 = vmatpush.msrb.mxu0 %v629_v0 }
  0x3d   :  { %187 = vmatmul.f32.gmra.mxu0 %v93_v1  ;;  %210 = vmatmul.f32.gmra.mxu1 %v93_v1 }
  0x3e   :  { %233 = vmatmul.f32.gmra.mxu2 %v93_v1  ;;  %256 = vmatmul.f32.gmra.mxu3 %v93_v1  ;;  %v645_v1 = vld [vmem:[#allocation9 + $0xf8] sm:$0xff] }
  0x3f   :  { %701 = vmatpush.msrb.mxu1 %v645_v1  ;;  %v624_v1 = vld [vmem:[#allocation9 + $0x50] sm:$0xff] }
  0xb2   :  { %v185_v5 = vpop.f32.mrf.mxu0  ;;  %v208_v6 = vpop.f32.mrf.mxu1 }
  0xb3   :  { %v1025_v7 = vadd.f32 %v185_v5, %v160_v3  ;;  %v1029_v8 = vadd.f32 %v208_v6, %v161_v4 }
  0xb5   :  { %v1032_v9 = vmul.f32 0.70710677, %v1025_v7  ;;  %v1035_v10 = vmul.f32 0.70710677, %v1029_v8 }
  0xb7   :  { %v276_v13 = vmul.f32 %v1032_v9, %v1032_v9  ;;  %v316_v14 = vmul.f32 %v1035_v10, %v1035_v10 }
  0xb9   :  { %v1043_v15 = vmin.f32 %v276_v13, 16.0  ;;  %v1045_v16 = vmin.f32 %v316_v14, 16.0  ;;  %v231_v17 = vpop.f32.mrf.mxu2  ;;  %v254_v18 = vpop.f32.mrf.mxu3 }
  0xba   :  { %v1049_v19 = vadd.f32 %v231_v17, %v162_v11  ;;  %v1053_v20 = vadd.f32 %v254_v18, %v163_v12  ;;  %v188_v44 = vpop.f32.mrf.mxu0 }
  0xbb   :  { %v278_v21 = vmul.f32 2.1237322e-06, %v1043_v15  ;;  %v289_v22 = vmul.f32 3.8918573e-05, %v1043_v15  ;;  %v318_v23 = vmul.f32 2.1237322e-06, %v1045_v16  ;;  %v1083_v55 = vadd.f32 %v188_v44, %v160_v3 }
  0xbc   :  { %v329_v24 = vmul.f32 3.8918573e-05, %v1045_v16  ;;  %v1060_v25 = vmul.f32 0.70710677, %v1049_v19  ;;  %v1065_v31 = vmul.f32 0.70710677, %v1053_v20 }
  0xbd   :  { %v279_v26 = vadd.f32 0.00028619796, %v278_v21  ;;  %v290_v27 = vadd.f32 0.001143296, %v289_v22  ;;  %v319_v28 = vadd.f32 0.00028619796, %v318_v23 }
  0xbe   :  { %v330_v29 = vadd.f32 0.001143296, %v329_v24  ;;  %v356_v30 = vmul.f32 %v1060_v25, %v1060_v25  ;;  %v396_v37 = vmul.f32 %v1065_v31, %v1065_v31  ;;  %v1096_v23 = vmul.f32 0.70710677, %v1083_v55  ;;  %v628_v24 = vld [vmem:[#allocation9 + $0x70] sm:$0xff]  ;;  %v661_v44 = vld [vmem:[#allocation9 + $0x178] sm:$0xff] }
  0xbf   :  { %v280_v32 = vmul.f32 %v279_v26, %v1043_v15  ;;  %v291_v33 = vmul.f32 %v290_v27, %v1043_v15  ;;  %v320_v34 = vmul.f32 %v319_v28, %v1045_v16  ;;  %v644_v26 = vld [vmem:[#allocation9 + $0xf0] sm:$0xff]  ;;  %679 = vmatpush.msrb.mxu0 %v628_v24  ;;  %724 = vmatpush.msrb.mxu2 %v661_v44 }
  0xc0   :  { %v331_v35 = vmul.f32 %v330_v29, %v1045_v16  ;;  %v1071_v36 = vmin.f32 %v356_v30, 16.0  ;;  %v1080_v48 = vmin.f32 %v396_v37, 16.0  ;;  %702 = vmatpush.msrb.mxu1 %v644_v26  ;;  %v627_v30 = vld [vmem:[#allocation9 + $0x68] sm:$0xff] }
  0xc1   :  { %v281_v38 = vadd.f32 0.0036580483, %v280_v32  ;;  %v292_v39 = vadd.f32 0.014752088, %v291_v33  ;;  %v321_v40 = vadd.f32 0.0036580483, %v320_v34  ;;  %680 = vmatpush.msrb.mxu0 %v627_v30 }
  0xc2   :  { %v332_v41 = vadd.f32 0.014752088, %v331_v35  ;;  %v358_v42 = vmul.f32 2.1237322e-06, %v1071_v36  ;;  %v369_v43 = vmul.f32 3.8918573e-05, %v1071_v36 }
  0xc3   :  { %v282_v45 = vmul.f32 %v281_v38, %v1043_v15  ;;  %v293_v46 = vmul.f32 %v292_v39, %v1043_v15  ;;  %v322_v47 = vmul.f32 %v321_v40, %v1045_v16  ;;  %v398_v59 = vmul.f32 2.1237322e-06, %v1080_v48  ;;  %v643_v32 = vld [vmem:[#allocation9 + $0xe8] sm:$0xff]  ;;  %v626_v40 = vld [vmem:[#allocation9 + $0x60] sm:$0xff] }
  0xc4   :  { %v333_v49 = vmul.f32 %v332_v41, %v1045_v16  ;;  %v359_v50 = vadd.f32 0.00028619796, %v358_v42  ;;  %v370_v51 = vadd.f32 0.001143296, %v369_v43  ;;  %v409_v63 = vmul.f32 3.8918573e-05, %v1080_v48  ;;  %703 = vmatpush.msrb.mxu1 %v643_v32  ;;  %681 = vmatpush.msrb.mxu0 %v626_v40 }
  0xc5   :  { %v283_v52 = vadd.f32 0.05243302, %v282_v45  ;;  %v294_v53 = vadd.f32 0.112945676, %v293_v46  ;;  %v323_v54 = vadd.f32 0.05243302, %v322_v47  ;;  %v211_v47 = vpop.f32.mrf.mxu1 }
  0xc6   :  { %v334_v56 = vadd.f32 0.112945676, %v333_v49  ;;  %v360_v57 = vmul.f32 %v359_v50, %v1071_v36  ;;  %v371_v58 = vmul.f32 %v370_v51, %v1071_v36  ;;  %v399_v13 = vadd.f32 0.00028619796, %v398_v59  ;;  %v642_v43 = vld [vmem:[#allocation9 + $0xe0] sm:$0xff]  ;;  %v677_v45 = vld [vmem:[#allocation9 + $0x1f8] sm:$0xff] }
  0xc7   :  { %v284_v60 = vmul.f32 %v283_v52, %v1043_v15  ;;  %v295_v61 = vmul.f32 %v294_v53, %v1043_v15  ;;  %v324_v62 = vmul.f32 %v323_v54, %v1045_v16  ;;  %v410_v29 = vadd.f32 0.001143296, %v409_v63  ;;  %704 = vmatpush.msrb.mxu1 %v642_v43  ;;  %v625_v49 = vld [vmem:[#allocation9 + $0x58] sm:$0xff]  ;;  %v660_v51 = vld [vmem:[#allocation9 + $0x170] sm:$0xff]  ;;  %747 = vmatpush.msrb.mxu3 %v677_v45  ;;  %v674_v30 = vld [vmem:[#allocation9 + $0x1e0] sm:$0xff] }
  0xc8   :  { %v335_v3 = vmul.f32 %v334_v56, %v1045_v16  ;;  %v361_v5 = vadd.f32 0.0036580483, %v360_v57  ;;  %v372_v6 = vadd.f32 0.014752088, %v371_v58  ;;  %v400_v22 = vmul.f32 %v399_v13, %v1080_v48  ;;  %v641_v50 = vld [vmem:[#allocation9 + $0xd8] sm:$0xff]  ;;  %v234_v56 = vpop.f32.mrf.mxu2  ;;  %v257_v57 = vpop.f32.mrf.mxu3  ;;  %682 = vmatpush.msrb.mxu0 %v625_v49  ;;  %725 = vmatpush.msrb.mxu2 %v660_v51  ;;  %v656_v49 = vld [vmem:[#allocation9 + $0x150] sm:$0xff] }
  0xc9   :  { %v285_v14 = vadd.f32 0.18741608, %v284_v60  ;;  %v296_v17 = vadd.f32 0.4994258, %v295_v61  ;;  %v325_v28 = vadd.f32 0.18741608, %v324_v62  ;;  %v411_v46 = vmul.f32 %v410_v29, %v1080_v48  ;;  %705 = vmatpush.msrb.mxu1 %v641_v50 }
  0xca   :  { %v336_v18 = vadd.f32 0.4994258, %v335_v3  ;;  %v373_v21 = vmul.f32 %v372_v6, %v1071_v36  ;;  %v362_v35 = vmul.f32 %v361_v5, %v1071_v36  ;;  %v401_v39 = vadd.f32 0.0036580483, %v400_v22  ;;  %v640_v3 = vld [vmem:[#allocation9 + $0xd0] sm:$0xff]  ;;  %683 = vmatpush.msrb.mxu0 %v624_v1  ;;  %v658_v29 = vld [vmem:[#allocation9 + $0x160] sm:$0xff] }
  0xcb   :  { %v297_v27 = vmul.f32 %v296_v17, %v1043_v15  ;;  %v286_v33 = vmul.f32 %v285_v14, %v1043_v15  ;;  %v326_v15 = vmul.f32 %v325_v28, %v1045_v16  ;;  %v436_v54 = vmul.f32 %v1096_v23, %v1096_v23  ;;  %706 = vmatpush.msrb.mxu1 %v640_v3  ;;  %v659_v14 = vld [vmem:[#allocation9 + $0x168] sm:$0xff]  ;;  %v673_v43 = vld [vmem:[#allocation9 + $0x1d8] sm:$0xff] }
  0xcc   :  { %v337_v34 = vmul.f32 %v336_v18, %v1045_v16  ;;  %v374_v37 = vadd.f32 0.112945676, %v373_v21  ;;  %v363_v53 = vadd.f32 0.05243302, %v362_v35  ;;  %v676_v16 = vld [vmem:[#allocation9 + $0x1f0] sm:$0xff]  ;;  %v402_v58 = vmul.f32 %v401_v39, %v1080_v48  ;;  %726 = vmatpush.msrb.mxu2 %v659_v14  ;;  %v623_v21 = vld [vmem:[#allocation9 + $0x48] sm:$0xff] }
  0xcd   :  { %v1102_v38 = vadd.f32 1.0, %v297_v27  ;;  %v287_v52 = vadd.f32 1.1283791, %v286_v33  ;;  %v1116_v60 = vadd.f32 %v211_v47, %v161_v4  ;;  %748 = vmatpush.msrb.mxu3 %v676_v16  ;;  %v327_v61 = vadd.f32 1.1283791, %v326_v15  ;;  %684 = vmatpush.msrb.mxu0 %v623_v21  ;;  %v639_v28 = vld [vmem:[#allocation9 + $0xc8] sm:$0xff] }
  0xce   :  { %v1104_v41 = vadd.f32 1.0, %v337_v34  ;;  %v375_v42 = vmul.f32 %v374_v37, %v1071_v36  ;;  %v412_v62 = vadd.f32 0.014752088, %v411_v46  ;;  %v1120_v63 = vadd.f32 %v234_v56, %v162_v11  ;;  %v675_v11 = vld [vmem:[#allocation9 + $0x1e8] sm:$0xff]  ;;  %707 = vmatpush.msrb.mxu1 %v639_v28  ;;  %727 = vmatpush.msrb.mxu2 %v658_v29  ;;  %v622_v37 = vld [vmem:[#allocation9 + $0x40] sm:$0xff]  ;;  %v621_v46 = vld [vmem:[#allocation9 + $0x38] sm:$0xff] }
  0xcf   :  { %820 = vrcp.f32 %v1102_v38  ;;  %v1124_v0 = vadd.f32 %v257_v57, %v163_v12  ;;  %v1127_v5 = vmul.f32 %v287_v52, %v1032_v9  ;;  %v364_v4 = vmul.f32 %v363_v53, %v1071_v36  ;;  %749 = vmatpush.msrb.mxu3 %v675_v11  ;;  %v638_v39 = vld [vmem:[#allocation9 + $0xc0] sm:$0xff]  ;;  %685 = vmatpush.msrb.mxu0 %v622_v37  ;;  %v637_v47 = vld [vmem:[#allocation9 + $0xb8] sm:$0xff]  ;;  %v620_v56 = vld [vmem:[#allocation9 + $0x30] sm:$0xff] }
  0xd0   :  { %822 = vrcp.f32 %v1104_v41  ;;  %v376_v59 = vadd.f32 0.4994258, %v375_v42  ;;  %v1131_v13 = vmin.f32 %v436_v54, 16.0  ;;  %v308_v2 = vand.u32 2147483647, %v1102_v38  ;;  %708 = vmatpush.msrb.mxu1 %v638_v39  ;;  %v672_v54 = vld [vmem:[#allocation9 + $0x1d0] sm:$0xff] }
  0xd1   :  { %v310_v12 = vand.u32 2147483648, %v1102_v38  ;;  %v403_v18 = vadd.f32 0.05243302, %v402_v58  ;;  %v413_v9 = vmul.f32 %v412_v62, %v1080_v48  ;;  %vm304_vm0 = vweird.f32 %v1102_v38  ;;  %750 = vmatpush.msrb.mxu3 %v674_v30  ;;  %686 = vmatpush.msrb.mxu0 %v621_v46  ;;  %v636_v57 = vld [vmem:[#allocation9 + $0xb0] sm:$0xff]  ;;  %v655_v62 = vld [vmem:[#allocation9 + $0x148] sm:$0xff]  ;;  %v618_v28 = vld [vmem:[#allocation9 + $0x20] sm:$0xff] }
  0xd2   :  { %v377_v6 = vmul.f32 %v376_v59, %v1071_v36  ;;  %v1146_v27 = vmul.f32 0.70710677, %v1116_v60  ;;  %v1149_v32 = vmul.f32 %v327_v61, %v1035_v10  ;;  %v348_v34 = vand.u32 2147483647, %v1104_v41  ;;  %v657_v10 = vld [vmem:[#allocation9 + $0x158] sm:$0xff]  ;;  %709 = vmatpush.msrb.mxu1 %v637_v47  ;;  %v619_v14 = vld [vmem:[#allocation9 + $0x28] sm:$0xff] }
  0xd3   :  { %v414_v35 = vadd.f32 0.112945676, %v413_v9  ;;  %v350_v42 = vand.u32 2147483648, %v1104_v41  ;;  %vm344_vm2 = vweird.f32 %v1104_v41  ;;  %v1160_v15 = vmul.f32 0.70710677, %v1120_v63  ;;  %728 = vmatpush.msrb.mxu2 %v657_v10  ;;  %751 = vmatpush.msrb.mxu3 %v673_v43  ;;  %v635_v11 = vld [vmem:[#allocation9 + $0xa8] sm:$0xff] }
  0xd4   :  { %v1143_v26 = vadd.f32 1.0, %v377_v6  ;;  %v365_v51 = vadd.f32 0.18741608, %v364_v4  ;;  %v404_v52 = vmul.f32 %v403_v18, %v1080_v48  ;;  %v476_v53 = vmul.f32 %v1146_v27, %v1146_v27  ;;  %687 = vmatpush.msrb.mxu0 %v620_v56  ;;  %v671_v6 = vld [vmem:[#allocation9 + $0x1c8] sm:$0xff]  ;;  %710 = vmatpush.msrb.mxu1 %v636_v57  ;;  %v634_v39 = vld [vmem:[#allocation9 + $0xa0] sm:$0xff]  ;;  %v669_v43 = vld [vmem:[#allocation9 + $0x1b8] sm:$0xff] }
  0xd5   :  { %v1133_v17 = vpop.eup %820  ;;  %v415_v45 = vmul.f32 %v414_v35, %v1080_v48  ;;  %v438_v61 = vmul.f32 2.1237322e-06, %v1131_v13  ;;  %729 = vmatpush.msrb.mxu2 %v656_v49  ;;  %vm1178_vm5 = vcmp.eq.f32.partialorder %v308_v2, 8.507059e+37  ;;  %vm1182_vm6 = vcmp.eq.f32.partialorder %v348_v34, 8.507059e+37  ;;  %752 = vmatpush.msrb.mxu3 %v672_v54  ;;  %v652_v49 = vld [vmem:[#allocation9 + $0x130] sm:$0xff]  ;;  %v631_v4 = vld [vmem:[#allocation9 + $0x88] sm:$0xff] }
  0xd6   :  { %v1138_v22 = vpop.eup %822  ;;  %v300_v24 = vmul.f32 %v1133_v17, %v1102_v38  ;;  %vm305_vm1 = vweird.f32 %v1133_v17  ;;  %824 = vrcp.f32 %v1143_v26  ;;  %v311_v38 = vor.u32 1.1754944e-38, %v310_v12  ;;  %v654_v12 = vld [vmem:[#allocation9 + $0x140] sm:$0xff]  ;;  %688 = vmatpush.msrb.mxu0 %v619_v14  ;;  %711 = vmatpush.msrb.mxu1 %v635_v11  ;;  %v616_v16 = vld [vmem:[#allocation9 + $0x10] sm:$0xff] }
  0xd7   :  { %v340_v33 = vmul.f32 %v1138_v22, %v1104_v41  ;;  %vm1170_vm3 = vmor %vm304_vm0, %vm305_vm1  ;;  %vm345_vm4 = vweird.f32 %v1138_v22  ;;  %v416_v59 = vadd.f32 0.4994258, %v415_v45  ;;  %v1188_v21 = vmin.f32 %v476_v53, 16.0  ;;  %730 = vmatpush.msrb.mxu2 %v655_v62  ;;  %753 = vmatpush.msrb.mxu3 %v671_v6  ;;  %v650_v6 = vld [vmem:[#allocation9 + $0x120] sm:$0xff] }
  0xd8   :  { %v301_v40 = vsub.f32 1.0, %v300_v24  ;;  %v516_v2 = vmul.f32 %v1160_v15, %v1160_v15  ;;  %v670_v24 = vld [vmem:[#allocation9 + $0x1c0] sm:$0xff]  ;;  %vm1201_vm7 = vmor %vm344_vm2, %vm345_vm4  ;;  %v351_v34 = vor.u32 1.1754944e-38, %v350_v42  ;;  %v366_v35 = vmul.f32 %v365_v51, %v1071_v36  ;;  %v653_v42 = vld [vmem:[#allocation9 + $0x138] sm:$0xff]  ;;  %689 = vmatpush.msrb.mxu0 %v618_v28  ;;  %712 = vmatpush.msrb.mxu1 %v634_v39 }
  0xd9   :  { %v341_v44 = vsub.f32 1.0, %v340_v33  ;;  %v417_v9 = vmul.f32 %v416_v59, %v1080_v48  ;;  %v405_v37 = vadd.f32 0.18741608, %v404_v52  ;;  %v439_v10 = vadd.f32 0.00028619796, %v438_v61  ;;  %731 = vmatpush.msrb.mxu2 %v654_v12  ;;  %v617_v36 = vld [vmem:[#allocation9 + $0x18] sm:$0xff]  ;;  %754 = vmatpush.msrb.mxu3 %v670_v24 }
  0xda   :  { %v302_v50 = vmul.f32 %v1133_v17, %v301_v40  ;;  %v1219_v47 = vmul.f32 0.70710677, %v1124_v0  ;;  %v478_v52 = vmul.f32 2.1237322e-06, %v1188_v21  ;;  %v1223_v53 = vmin.f32 %v516_v2, 16.0  ;;  %690 = vmatpush.msrb.mxu0 %v617_v36  ;;  %v614_v2 = vld [vmem:[#allocation9] sm:$0xff] }
  0xdb   :  { %v342_v58 = vmul.f32 %v1138_v22, %v341_v44  ;;  %v1216_v46 = vadd.f32 1.0, %v417_v9  ;;  %732 = vmatpush.msrb.mxu2 %v653_v42  ;;  %v367_v56 = vadd.f32 1.1283791, %v366_v35  ;;  %v390_v57 = vand.u32 2147483648, %v1143_v26  ;;  %755 = vmatpush.msrb.mxu3 %v669_v43  ;;  %v649_v33 = vld [vmem:[#allocation9 + $0x118] sm:$0xff]  ;;  %v648_v36 = vld [vmem:[#allocation9 + $0x110] sm:$0xff] }
  0xdc   :  { %v303_v1 = vadd.f32 %v1133_v17, %v302_v50  ;;  %v1192_v29 = vpop.eup %824  ;;  %v260_v50 = vmul.f32 0.5, %v1025_v7  ;;  %v651_v7 = vld [vmem:[#allocation9 + $0x128] sm:$0xff]  ;;  %v388_v61 = vand.u32 2147483647, %v1143_v26  ;;  %v406_v62 = vmul.f32 %v405_v37, %v1080_v48  ;;  %691 = vmatpush.msrb.mxu0 %v616_v16 }
  0xdd   :  { %v343_v18 = vadd.f32 %v1138_v22, %v342_v58  ;;  %v380_v41 = vmul.f32 %v1192_v29, %v1143_v26  ;;  %826 = vrcp.f32 %v1216_v46  ;;  %v632_v58 = vld [vmem:[#allocation9 + $0x90] sm:$0xff]  ;;  %vm385_vm8 = vweird.f32 %v1192_v29  ;;  %733 = vmatpush.msrb.mxu2 %v652_v49 }
  0xde   :  { %v307_v30 = vsel %vm1170_vm3, %v1133_v17, %v303_v1  ;;  %v615_v1 = vld [vmem:[#allocation9 + $0x8] sm:$0xff]  ;;  %v261_v3 = vmul.f32 0.5, %v1029_v8  ;;  %vm384_vm9 = vweird.f32 %v1143_v26  ;;  %v440_v48 = vmul.f32 %v439_v10, %v1131_v13  ;;  %v666_v8 = vld [vmem:[#allocation9 + $0x1a0] sm:$0xff] }
  0xdf   :  { %v312_v40 = vsel %vm1178_vm5, %v311_v38, %v307_v30  ;;  %v347_v17 = vsel %vm1201_vm7, %v1138_v22, %v343_v18  ;;  %v633_v22 = vld [vmem:[#allocation9 + $0x98] sm:$0xff]  ;;  %v381_v51 = vsub.f32 1.0, %v380_v41  ;;  %v556_v38 = vmul.f32 %v1219_v47, %v1219_v47  ;;  %734 = vmatpush.msrb.mxu2 %v651_v7  ;;  %vm1243_vm10 = vmor %vm384_vm9, %vm385_vm8  ;;  %692 = vmatpush.msrb.mxu0 %v615_v1  ;;  %v630_v30 = vld [vmem:[#allocation9 + $0x80] sm:$0xff] }
  0xe0   :  { %v313_v44 = vmul.f32 %v312_v40, %v1127_v5  ;;  %v352_v45 = vsel %vm1182_vm6, %v351_v34, %v347_v17  ;;  %v668_v5 = vld [vmem:[#allocation9 + $0x1b0] sm:$0xff]  ;;  %713 = vmatpush.msrb.mxu1 %v633_v22  ;;  %v479_v18 = vadd.f32 0.00028619796, %v478_v52  ;;  %v518_v9 = vmul.f32 2.1237322e-06, %v1223_v53  ;;  %v665_v40 = vld [vmem:[#allocation9 + $0x198] sm:$0xff] }
  0xe1   :  { %v353_v54 = vmul.f32 %v352_v45, %v1149_v32  ;;  %v382_v59 = vmul.f32 %v1192_v29, %v381_v51  ;;  %v667_v32 = vld [vmem:[#allocation9 + $0x1a8] sm:$0xff]  ;;  %756 = vmatpush.msrb.mxu3 %v668_v5  ;;  %v391_v24 = vor.u32 1.1754944e-38, %v390_v57  ;;  %v1247_v28 = vmin.f32 %v556_v38, 16.0  ;;  %735 = vmatpush.msrb.mxu2 %v650_v6  ;;  %v664_v22 = vld [vmem:[#allocation9 + $0x190] sm:$0xff] }
  0xe2   :  { %v802_v14 = vclamps-f32 %v313_v44, 1.0  ;;  %714 = vmatpush.msrb.mxu1 %v632_v58  ;;  %v368_v37 = vmul.f32 %v367_v56, %v1060_v25  ;;  %vm389_vm11 = vcmp.eq.f32.partialorder %v388_v61, 8.507059e+37  ;;  %v407_v26 = vadd.f32 1.1283791, %v406_v62  ;;  %693 = vmatpush.msrb.mxu0 %v614_v2 }
  0xe3   :  { %v383_v11 = vadd.f32 %v1192_v29, %v382_v59  ;;  %757 = vmatpush.msrb.mxu3 %v667_v32  ;;  %v803_v35 = vclamps-f32 %v353_v54, 1.0  ;;  %v1253_v17 = vpop.eup %826  ;;  %v558_v10 = vmul.f32 2.1237322e-06, %v1247_v28  ;;  %v262_v25 = vmul.f32 0.5, %v1049_v19  ;;  %736 = vmatpush.msrb.mxu2 %v649_v33  ;;  %v663_v19 = vld [vmem:[#allocation9 + $0x188] sm:$0xff]  ;;  %v646_v59 = vld [vmem:[#allocation9 + $0x100] sm:$0xff] }
  0xe4   :  { %v596_v34 = vadd.f32 1.0, %v802_v14  ;;  %715 = vmatpush.msrb.mxu1 %v631_v4  ;;  %v441_v45 = vadd.f32 0.0036580483, %v440_v48  ;;  %v480_v49 = vmul.f32 %v479_v18, %v1188_v21  ;;  %v519_v51 = vadd.f32 0.00028619796, %v518_v9 }
  0xe5   :  { %v387_v39 = vsel %vm1243_vm10, %v1192_v29, %v383_v11  ;;  %758 = vmatpush.msrb.mxu3 %v666_v8  ;;  %v597_v43 = vadd.f32 1.0, %v803_v35  ;;  %v420_v29 = vmul.f32 %v1253_v17, %v1216_v46  ;;  %v559_v52 = vadd.f32 0.00028619796, %v558_v10  ;;  %737 = vmatpush.msrb.mxu2 %v648_v36 }
  0xe6   :  { %v392_v41 = vsel %vm389_vm11, %v391_v24, %v387_v39  ;;  %v604_v42 = vmul.f32 %v596_v34, %v260_v50  ;;  %716 = vmatpush.msrb.mxu1 %v630_v30  ;;  %v647_v50 = vld [vmem:[#allocation9 + $0x108] sm:$0xff]  ;;  %v408_v54 = vmul.f32 %v407_v26, %v1065_v31  ;;  %v449_v16 = vmul.f32 3.8918573e-05, %v1131_v13  ;;  %v662_v31 = vld [vmem:[#allocation9 + $0x180] sm:$0xff] }
  0xe7   :  { %v393_v44 = vmul.f32 %v392_v41, %v368_v37  ;;  %759 = vmatpush.msrb.mxu3 %v665_v40  ;;  %v605_v5 = vmul.f32 %v597_v43, %v261_v3  ;;  %v421_v56 = vsub.f32 1.0, %v420_v29  ;;  %vm424_vm12 = vweird.f32 %v1216_v46  ;;  %738 = vmatpush.msrb.mxu2 %v647_v50 }
  0xe8   :  { %694 = vmatmul.f32.vlgmr.msrb.gmra.mxu0 %v604_v42  ;;  %v428_v58 = vand.u32 2147483647, %v1216_v46  ;;  %v430_v7 = vand.u32 2147483648, %v1216_v46  ;;  %v489_v61 = vmul.f32 3.8918573e-05, %v1188_v21  ;;  %vm425_vm13 = vweird.f32 %v1253_v17 }
  0xe9   :  { %v804_v57 = vclamps-f32 %v393_v44, 1.0  ;;  %717 = vmatmul.f32.vlgmr.msrb.gmra.mxu1 %v605_v5  ;;  %760 = vmatpush.msrb.mxu3 %v664_v22  ;;  %v422_v62 = vmul.f32 %v1253_v17, %v421_v56  ;;  %v450_v1 = vadd.f32 0.001143296, %v449_v16  ;;  %v481_v3 = vadd.f32 0.0036580483, %v480_v49  ;;  %vm426_vm14 = vmor %vm424_vm12, %vm425_vm13 }
  0xea   :  { %v520_v38 = vmul.f32 %v519_v51, %v1223_v53  ;;  %v560_v4 = vmul.f32 %v559_v52, %v1247_v28  ;;  %v490_v6 = vadd.f32 0.001143296, %v489_v61  ;;  %739 = vmatpush.msrb.mxu2 %v646_v59  ;;  %v529_v18 = vmul.f32 3.8918573e-05, %v1223_v53 }
  0xeb   :  { %v598_v32 = vadd.f32 1.0, %v804_v57  ;;  %761 = vmatpush.msrb.mxu3 %v663_v19  ;;  %v423_v14 = vadd.f32 %v1253_v17, %v422_v62  ;;  %v451_v48 = vmul.f32 %v450_v1, %v1131_v13  ;;  %vm429_vm15 = vcmp.eq.f32.partialorder %v428_v58, 8.507059e+37 }
  0xec   :  { %v431_v9 = vor.u32 1.1754944e-38, %v430_v7  ;;  %v442_v8 = vmul.f32 %v441_v45, %v1131_v13  ;;  %v491_v2 = vmul.f32 %v490_v6, %v1188_v21  ;;  %v530_v30 = vadd.f32 0.001143296, %v529_v18 }
  0xed   :  { %v606_v11 = vmul.f32 %v598_v32, %v262_v25  ;;  %762 = vmatpush.msrb.mxu3 %v662_v31  ;;  %v427_v12 = vsel %vm426_vm14, %v1253_v17, %v423_v14  ;;  %v452_v24 = vadd.f32 0.014752088, %v451_v48  ;;  %v569_v33 = vmul.f32 3.8918573e-05, %v1247_v28 }
  0xee   :  { %v432_v34 = vsel %vm429_vm15, %v431_v9, %v427_v12  ;;  %v482_v35 = vmul.f32 %v481_v3, %v1188_v21  ;;  %v521_v37 = vadd.f32 0.0036580483, %v520_v38  ;;  %v561_v46 = vadd.f32 0.0036580483, %v560_v4 }
  0xef   :  { %740 = vmatmul.f32.vlgmr.msrb.gmra.mxu2 %v606_v11  ;;  %v433_v39 = vmul.f32 %v432_v34, %v408_v54  ;;  %v453_v26 = vmul.f32 %v452_v24, %v1131_v13  ;;  %v492_v40 = vadd.f32 0.014752088, %v491_v2  ;;  %v531_v41 = vmul.f32 %v530_v30, %v1223_v53 }
  0xf0   :  { %v263_v10 = vmul.f32 0.5, %v1053_v20  ;;  %v443_v42 = vadd.f32 0.05243302, %v442_v8  ;;  %v570_v17 = vadd.f32 0.001143296, %v569_v33  ;;  %v522_v45 = vmul.f32 %v521_v37, %v1223_v53 }
  0xf1   :  { %v805_v43 = vclamps-f32 %v433_v39, 1.0  ;;  %v454_v36 = vadd.f32 0.112945676, %v453_v26  ;;  %v493_v25 = vmul.f32 %v492_v40, %v1188_v21  ;;  %v532_v44 = vadd.f32 0.014752088, %v531_v41 }
  0xf2   :  { %v483_v29 = vadd.f32 0.05243302, %v482_v35  ;;  %v562_v22 = vmul.f32 %v561_v46, %v1247_v28  ;;  %v571_v49 = vmul.f32 %v570_v17, %v1247_v28  ;;  %v444_v50 = vmul.f32 %v443_v42, %v1131_v13 }
  0xf3   :  { %v599_v51 = vadd.f32 1.0, %v805_v43  ;;  %v455_v52 = vmul.f32 %v454_v36, %v1131_v13  ;;  %v494_v5 = vadd.f32 0.112945676, %v493_v25  ;;  %v533_v20 = vmul.f32 %v532_v44, %v1223_v53 }
  0xf4   :  { %v572_v54 = vadd.f32 0.014752088, %v571_v49  ;;  %v484_v58 = vmul.f32 %v483_v29, %v1188_v21  ;;  %v523_v7 = vadd.f32 0.05243302, %v522_v45  ;;  %v563_v61 = vadd.f32 0.05243302, %v562_v22 }
  0xf5   :  { %v607_v56 = vmul.f32 %v599_v51, %v263_v10  ;;  %v456_v19 = vadd.f32 0.4994258, %v455_v52  ;;  %v495_v57 = vmul.f32 %v494_v5, %v1188_v21  ;;  %v534_v16 = vadd.f32 0.112945676, %v533_v20 }
  0xf6   :  { %v573_v59 = vmul.f32 %v572_v54, %v1247_v28  ;;  %v445_v3 = vadd.f32 0.18741608, %v444_v50  ;;  %v485_v14 = vadd.f32 0.18741608, %v484_v58  ;;  %v524_v48 = vmul.f32 %v523_v7, %v1223_v53 }
  0xf7   :  { %763 = vmatmul.f32.vlgmr.msrb.gmra.mxu3 %v607_v56  ;;  %v457_v62 = vmul.f32 %v456_v19, %v1131_v13  ;;  %v496_v31 = vadd.f32 0.4994258, %v495_v57  ;;  %v535_v32 = vmul.f32 %v534_v16, %v1223_v53  ;;  %v564_v18 = vmul.f32 %v563_v61, %v1247_v28 }
  0xf8   :  { %v574_v1 = vadd.f32 0.112945676, %v573_v59  ;;  %v446_v12 = vmul.f32 %v445_v3, %v1131_v13  ;;  %v486_v24 = vmul.f32 %v485_v14, %v1188_v21  ;;  %v525_v30 = vadd.f32 0.18741608, %v524_v48 }
  0xf9   :  { %v458_v38 = vadd.f32 1.0, %v457_v62  ;;  %v497_v4 = vmul.f32 %v496_v31, %v1188_v21  ;;  %v536_v6 = vadd.f32 0.4994258, %v535_v32  ;;  %v565_v33 = vadd.f32 0.18741608, %v564_v18 }
  0xfa   :  { %v575_v11 = vmul.f32 %v574_v1, %v1247_v28  ;;  %v447_v46 = vadd.f32 1.1283791, %v446_v12  ;;  %v487_v39 = vadd.f32 1.1283791, %v486_v24  ;;  %v526_v41 = vmul.f32 %v525_v30, %v1223_v53 }
  0xfb   :  { %828 = vrcp.f32 %v458_v38  ;;  %v498_v9 = vadd.f32 1.0, %v497_v4  ;;  %v537_v8 = vmul.f32 %v536_v6, %v1223_v53  ;;  %v566_v13 = vmul.f32 %v565_v33, %v1247_v28 }
  0xfc   :  { %v576_v2 = vadd.f32 0.4994258, %v575_v11  ;;  %v468_v42 = vand.u32 2147483647, %v458_v38  ;;  %v264_v17 = vmul.f32 0.5, %v1083_v55  ;;  %v448_v43 = vmul.f32 %v447_v46, %v1096_v23 }
  0xfd   :  { %830 = vrcp.f32 %v498_v9  ;;  %v1304_v34 = vadd.f32 1.0, %v537_v8  ;;  %v470_v36 = vand.u32 2147483648, %v458_v38  ;;  %v488_v44 = vmul.f32 %v487_v39, %v1146_v27 }
  0xfe   :  { %v577_v35 = vmul.f32 %v576_v2, %v1247_v28  ;;  %v508_v45 = vand.u32 2147483647, %v498_v9  ;;  %v527_v53 = vadd.f32 1.1283791, %v526_v41  ;;  %v567_v49 = vadd.f32 1.1283791, %v566_v13 }
  0xff   :  { %832 = vrcp.f32 %v1304_v34  ;;  %v510_v51 = vand.u32 2147483648, %v498_v9  ;;  %vm464_vm1 = vweird.f32 %v458_v38  ;;  %vm469_vm2 = vcmp.eq.f32.partialorder %v468_v42, 8.507059e+37 }
 0x100   :  { %v1308_v40 = vadd.f32 1.0, %v577_v35  ;;  %v471_v55 = vor.u32 1.1754944e-38, %v470_v36  ;;  %v550_v20 = vand.u32 2147483648, %v1304_v34  ;;  %vm504_vm5 = vweird.f32 %v498_v9 }
 0x101   :  { %v829_v37 = vpop.eup %828  ;;  %vm1318_vm6 = vcmp.eq.f32.partialorder %v508_v45, 8.507059e+37  ;;  %v511_v16 = vor.u32 1.1754944e-38, %v510_v51  ;;  %v548_v61 = vand.u32 2147483647, %v1304_v34  ;;  %vm544_vm9 = vweird.f32 %v1304_v34 }
 0x102   :  { %v460_v26 = vmul.f32 %v829_v37, %v458_v38  ;;  %834 = vrcp.f32 %v1308_v40  ;;  %vm465_vm0 = vweird.f32 %v829_v37  ;;  %v551_v31 = vor.u32 1.1754944e-38, %v550_v20 }
 0x103   :  { %v831_v21 = vpop.eup %830  ;;  %vm466_vm3 = vmor %vm464_vm1, %vm465_vm0  ;;  %v590_v4 = vand.u32 2147483648, %v1308_v40  ;;  %v588_v11 = vand.u32 2147483647, %v1308_v40  ;;  %v528_v48 = vmul.f32 %v527_v53, %v1160_v15  ;;  %vm549_vm12 = vcmp.eq.f32.partialorder %v548_v61, 8.507059e+37 }
 0x104   :  { %v461_v10 = vsub.f32 1.0, %v460_v26  ;;  %v500_v25 = vmul.f32 %v831_v21, %v498_v9  ;;  %vm505_vm4 = vweird.f32 %v831_v21  ;;  %vm584_vm13 = vweird.f32 %v1308_v40 }
 0x105   :  { %v833_v22 = vpop.eup %832  ;;  %vm506_vm7 = vmor %vm504_vm5, %vm505_vm4  ;;  %v265_v24 = vmul.f32 0.5, %v1116_v60  ;;  %v568_v35 = vmul.f32 %v567_v49, %v1219_v47  ;;  %vm589_vm15 = vcmp.eq.f32.partialorder %v588_v11, 8.507059e+37  ;;  %v266_v13 = vmul.f32 0.5, %v1120_v63 }
 0x106   :  { %v462_v29 = vmul.f32 %v829_v37, %v461_v10  ;;  %v501_v28 = vsub.f32 1.0, %v500_v25  ;;  %v540_v5 = vmul.f32 %v833_v22, %v1304_v34  ;;  %vm545_vm8 = vweird.f32 %v833_v22 }
 0x107   :  { %vm546_vm10 = vmor %vm544_vm9, %vm545_vm8  ;;  %v591_v34 = vor.u32 1.1754944e-38, %v590_v4  ;;  %v267_v10 = vmul.f32 0.5, %v1124_v0 }
 0x108   :  { %v463_v52 = vadd.f32 %v829_v37, %v462_v29  ;;  %v502_v23 = vmul.f32 %v831_v21, %v501_v28  ;;  %v835_v27 = vpop.eup %834  ;;  %v541_v56 = vsub.f32 1.0, %v540_v5  ;;  %v819_v29 = vld [vmem:[%s1348_s4] ss:$0 sm:$0xff] }
 0x109   :  { %v580_v58 = vmul.f32 %v835_v27, %v1308_v40  ;;  %vm585_vm11 = vweird.f32 %v835_v27 }
 0x10a   :  { %v467_v50 = vsel %vm466_vm3, %v829_v37, %v463_v52  ;;  %v503_v57 = vadd.f32 %v831_v21, %v502_v23  ;;  %v542_v59 = vmul.f32 %v833_v22, %v541_v56  ;;  %vm586_vm14 = vmor %vm584_vm13, %vm585_vm11 }
 0x10b   :  { %v472_v19 = vsel %vm469_vm2, %v471_v55, %v467_v50  ;;  %v581_v32 = vsub.f32 1.0, %v580_v58 }
 0x10c   :  { %v473_v7 = vmul.f32 %v472_v19, %v448_v43  ;;  %v507_v62 = vsel %vm506_vm7, %v831_v21, %v503_v57  ;;  %v543_v38 = vadd.f32 %v833_v22, %v542_v59 }
 0x10d   :  { %v512_v3 = vsel %vm1318_vm6, %v511_v16, %v507_v62  ;;  %v582_v14 = vmul.f32 %v835_v27, %v581_v32 }
 0x10e   :  { %v806_v1 = vclamps-f32 %v473_v7, 1.0  ;;  %v513_v6 = vmul.f32 %v512_v3, %v488_v44  ;;  %v547_v9 = vsel %vm546_vm10, %v833_v22, %v543_v38 }
 0x10f   :  { %v552_v2 = vsel %vm549_vm12, %v551_v31, %v547_v9  ;;  %v583_v12 = vadd.f32 %v835_v27, %v582_v14 }
 0x110   :  { %v600_v18 = vadd.f32 1.0, %v806_v1  ;;  %v807_v8 = vclamps-f32 %v513_v6, 1.0  ;;  %v553_v33 = vmul.f32 %v552_v2, %v528_v48 }
 0x111   :  { %v587_v46 = vsel %vm586_vm14, %v835_v27, %v583_v12 }
 0x112   :  { %v608_v30 = vmul.f32 %v600_v18, %v264_v17  ;;  %v601_v37 = vadd.f32 1.0, %v807_v8  ;;  %v808_v15 = vclamps-f32 %v553_v33, 1.0  ;;  %v592_v39 = vsel %vm589_vm15, %v591_v34, %v587_v46 }
 0x113   :  { %v593_v41 = vmul.f32 %v592_v39, %v568_v35 }
 0x114   :  { %697 = vmatmul.f32.gmra.mxu0 %v608_v30  ;;  %v609_v26 = vmul.f32 %v601_v37, %v265_v24  ;;  %v602_v21 = vadd.f32 1.0, %v808_v15 }
 0x115   :  { %v809_v40 = vclamps-f32 %v593_v41, 1.0 }
 0x116   :  { %720 = vmatmul.f32.gmra.mxu1 %v609_v26  ;;  %v610_v60 = vmul.f32 %v602_v21, %v266_v13 }
 0x117   :  { %v603_v42 = vadd.f32 1.0, %v809_v40 }
 0x118   :  { %743 = vmatmul.f32.gmra.mxu2 %v610_v60 }
 0x119   :  { %v611_v17 = vmul.f32 %v603_v42, %v267_v10 }
 0x11b   :  { %766 = vmatmul.f32.gmra.mxu3 %v611_v17 }
 0x165   :  { %v695_v47 = vpop.f32.mrf.mxu0 }
 0x166   :  { %v718_v43 = vpop.f32.mrf.mxu1 }
 0x167   :  { %v719_v36 = vadd.f32 %v718_v43, %v695_v47 }
 0x172   :  { %v741_v25 = vpop.f32.mrf.mxu2 }
 0x173   :  { %v742_v44 = vadd.f32 %v741_v25, %v719_v36 }
 0x17a   :  { %v764_v63 = vpop.f32.mrf.mxu3 }
 0x17b   :  { %v765_v45 = vadd.f32 %v764_v63, %v742_v44 }
 0x17d   :  { %v770_v22 = vadd.f32 %v819_v29, %v765_v45 }
 0x17f   :  { %779 = vst [vmem:[#allocation11] sm:$0xff] %v770_v22 }
 0x191   :  { %v698_v53 = vpop.f32.mrf.mxu0 }
 0x193   :  { %v721_v49 = vpop.f32.mrf.mxu1 }
 0x194   :  { %v722_v0 = vadd.f32 %v721_v49, %v698_v53 }
 0x19b   :  { %v744_v28 = vpop.f32.mrf.mxu2 }
 0x19c   :  { %v745_v51 = vadd.f32 %v744_v28, %v722_v0 }
 0x19e   :  { %v767_v52 = vpop.f32.mrf.mxu3 }
 0x19f   :  { %v768_v5 = vadd.f32 %v767_v52, %v745_v51 }
 0x1a1   :  { %v771_v55 = vadd.f32 %v819_v29, %v768_v5 }
 0x1a3   :  { %780 = vst [vmem:[#allocation11 + $0x8] sm:$0xff] %v771_v55 }
 0x1a4   :  { %793 = dma.vmem_to_hbm [thread:$0]  %s786_s16, 256, %s788_s19, [#allocation5], %s968_s30, %s968_s30, %s969_s6  }
 0x1a5   :  { %962 = dma.done.wait [#allocation5], 256  }
 0x1a6   :  { %963 = vsyncadd [#allocation5], 4294967040 }
 0x1a7   :  { %798 = vsyncpa [#allocation4], 1 }
 0x1a8   :  { %799 = vsyncpa [#allocation7], 1 }
 0x1a9   :  { %800 = vsyncpa [#allocation10], 1 }
 0x1aa   :  { %801 = vsyncpa [#allocation5], 1 }

</bundles_post_ra>
